<compile_context>
chip_gen: v7x
topology: tpu7x:2x2x1
jax: 0.10.0
libtpu: 0.0.40
codegen_flags: <defaults>
</compile_context>

<pallas_src>
import functools

import jax
import jax.numpy as jnp
from jax.experimental import pallas as pl
from jax.experimental.pallas import tpu as pltpu


# ----------------------------- kernel ----------------------------------------


def _bipgcrn_kernel(T, K, N, W, a_ref, xzr_ref, xc_ref, wgh_ref, wuh_ref,
                    out_ref, h_ref):
    """Single invocation: runs the whole bidirectional recurrence.

    Lane layouts (all "lanes form", node axis on rows):
      h / xmix_c / out rows : (N, W)   lanes = (direction, batch, channel)
      xmix_zr rows          : (N, 2W)  lanes = (gate z|r, direction, batch, ch)
      propagated (A @ .)    : (K*N, W) rows = (cheb_k, node)
      block-diag weights    : rows (k, d, b, c), cols match the outputs above
    """
    A = a_ref[...]                      # (K*N, N)  bf16, stacked supports
    Wgh = wgh_ref[...]                  # (K*W, 2W) bf16, block-diag gate weight
    Wuh = wuh_ref[...]                  # (K*W, W)  bf16, block-diag cand weight
    h_ref[...] = jnp.zeros_like(h_ref)

    def step(t, carry):
        h = h_ref[...]                                                   # (N, W) f32

        # -- gate graph-conv (h part): 1 propagation + 1 contraction matmul --
        ph = jnp.dot(A, h.astype(jnp.bfloat16),
                     preferred_element_type=jnp.float32)                 # (K*N, W)
        ph_l = jnp.concatenate([ph[k * N:(k + 1) * N] for k in range(K)],
                               axis=-1).astype(jnp.bfloat16)             # (N, K*W)
        zr = jax.nn.sigmoid(
            jnp.dot(ph_l, Wgh, preferred_element_type=jnp.float32)
            + xzr_ref[t])                                                # (N, 2W)
        z = zr[:, :W]
        r = zr[:, W:]

        # -- candidate graph-conv on z*h: 1 propagation + 1 contraction ------
        pzh = jnp.dot(A, (z * h).astype(jnp.bfloat16),
                      preferred_element_type=jnp.float32)                # (K*N, W)
        pzh_l = jnp.concatenate([pzh[k * N:(k + 1) * N] for k in range(K)],
                                axis=-1).astype(jnp.bfloat16)            # (N, K*W)
        hc = jnp.tanh(
            jnp.dot(pzh_l, Wuh, preferred_element_type=jnp.float32)
            + xc_ref[t])                                                 # (N, W)

        h_new = r * h + (1.0 - r) * hc
        h_ref[...] = h_new
        out_ref[t] = h_new            # state only; residual added in wrapper
        return carry

    jax.lax.fori_loop(0, T, step, 0)


# ----------------------------- wrapper ----------------------------------------


def cheb_polynomials(adj, cheb_k):
    n = adj.shape[0]
    polys = [jnp.eye(n, dtype=jnp.float32)]
    if cheb_k > 1:
        polys.append(adj.astype(jnp.float32))
    for _ in range(2, cheb_k):
        polys.append(2.0 * adj @ polys[-1] - polys[-2])
    return jnp.stack(polys, axis=0)  # (K, N, N)


def bipgcrn_forward(x, adj, params, cheb_k, dim_out):
    """x: (B, T, N, Din); adj: (N, N); returns (B, T, N, 2*dim_out) float32."""
    B, T, N, Din = x.shape
    if Din != dim_out:
        raise ValueError(
            f"PGCRN residual (x + states) requires dim_in == dim_out, "
            f"got {Din} vs {dim_out}")
    Dout = dim_out
    K = cheb_k
    W = 2 * B * Dout
    f32, bf16 = jnp.float32, jnp.bfloat16
    Wg, bg, Wu, bu = params  # (2,K,Din+Dout,2D), (2,1,2D), (2,K,Din+Dout,D), (2,1,D)

    supports = cheb_polynomials(adj, K)                                 # (K, N, N)
    a_stk = supports.reshape(K * N, N).astype(bf16)

    # ---- x path hoisted out of the recurrence (plain XLA, all T at once) ----
    # Lane layout (direction, batch, channel); direction 1 sees flipped time.
    x_f = jnp.transpose(x, (1, 2, 0, 3))                                # (T, N, B, Din)
    x_b = jnp.transpose(x[:, ::-1], (1, 2, 0, 3))
    x2 = jnp.stack([x_f, x_b], axis=2).astype(f32)                      # (T, N, 2, B, Din)
    x2_l = x2.reshape(T, N, 2 * B * Din)

    px = jnp.einsum('knm,tmz->tknz', supports.astype(bf16), x2_l.astype(bf16),
                    preferred_element_type=f32)                         # (T, K, N, 2*B*Din)
    px = px.reshape(T, K, N, 2, B, Din).astype(bf16)

    # Gate x-contraction + bias; output lanes (gate, direction, batch, out_ch).
    Wg_x = Wg[:, :, :Din, :].reshape(2, K, Din, 2, Dout).astype(bf16)   # (d,k,c,g,o)
    bg_r = jnp.transpose(bg.reshape(2, 2, Dout), (1, 0, 2))             # (g, d, o)
    xz = jnp.einsum('tkndbc,dkcgo->tngdbo', px, Wg_x,
                    preferred_element_type=f32)                         # (T,N,g,d,B,D)
    xmix_zr = (xz + bg_r[None, None, :, :, None, :]).reshape(T, N, 2 * W)

    # Candidate x-contraction + bias; output lanes (direction, batch, out_ch).
    Wu_x = Wu[:, :, :Din, :].astype(bf16)                               # (d, k, c, o)
    bu_r = bu.reshape(2, Dout)                                          # (d, o)
    xc = jnp.einsum('tkndbc,dkco->tndbo', px, Wu_x,
                    preferred_element_type=f32)                         # (T, N, 2, B, D)
    xmix_c = (xc + bu_r[None, None, :, None, :]).reshape(T, N, W)

    # ---- block-diagonal (direction x batch) h-weights, K folded into rows ----
    eye_d = jnp.eye(2, dtype=f32)
    eye_b = jnp.eye(B, dtype=f32)
    Wg_h = Wg[:, :, Din:, :].reshape(2, K, Dout, 2, Dout)               # (d,k,c,g,o)
    wgh_bd = jnp.einsum('dkcgo,de,bf->kdbcgefo', Wg_h, eye_d, eye_b)
    wgh_bd = wgh_bd.reshape(K * W, 2 * W).astype(bf16)   # rows (k,d,b,c) cols (g,d,b,o)
    Wu_h = Wu[:, :, Din:, :]                                            # (d, k, c, o)
    wuh_bd = jnp.einsum('dkco,de,bf->kdbcefo', Wu_h, eye_d, eye_b)
    wuh_bd = wuh_bd.reshape(K * W, W).astype(bf16)       # rows (k,d,b,c) cols (d,b,o)

    kernel = functools.partial(_bipgcrn_kernel, T, K, N, W)

    states = pl.pallas_call(
        kernel,
        out_shape=jax.ShapeDtypeStruct((T, N, W), jnp.float32),
        grid_spec=pltpu.PrefetchScalarGridSpec(
            num_scalar_prefetch=0,
            grid=(1,),  # whole recurrence inside one invocation (no grid overhead)
            in_specs=[
                pl.BlockSpec((K * N, N), lambda i: (0, 0)),
                pl.BlockSpec((T, N, 2 * W), lambda i: (0, 0, 0)),
                pl.BlockSpec((T, N, W), lambda i: (0, 0, 0)),
                pl.BlockSpec((K * W, 2 * W), lambda i: (0, 0)),
                pl.BlockSpec((K * W, W), lambda i: (0, 0)),
            ],
            out_specs=pl.BlockSpec((T, N, W), lambda i: (0, 0, 0)),
            scratch_shapes=[pltpu.VMEM((N, W), jnp.float32)],
        ),
        compiler_params=pltpu.CompilerParams(
            dimension_semantics=("arbitrary",)),
    )(a_stk, xmix_zr, xmix_c, wgh_bd, wuh_bd)

    # PGCRN residual + final layout (pure layout plumbing, fused by XLA).
    out = (x2_l + states).reshape(T, N, 2, B, Dout)
    out = jnp.transpose(out, (3, 0, 1, 2, 4)).reshape(B, T, N, 2 * Dout)
    return out


# ------------------------ pure-JAX reference ----------------------------------
# Mirrors the kernel's compute dtypes (bf16 matmul operands, f32 accumulation)
# and the original PyTorch structure (gconv on concatenated [x, h]).


def bipgcrn_reference(x, adj, params, cheb_k, dim_out):
    supports = cheb_polynomials(adj, cheb_k).astype(jnp.bfloat16)
    Wg, bg, Wu, bu = params
    Wg = Wg.astype(jnp.bfloat16)
    Wu = Wu.astype(jnp.bfloat16)
    B, T, N, Din = x.shape

    def gconv(xin, Wmat, b):
        acc = jnp.zeros((B, N, Wmat.shape[-1]), jnp.float32)
        xb = xin.astype(jnp.bfloat16)
        for k in range(cheb_k):
            xk = jnp.einsum('nm,bmc->bnc', supports[k], xb,
                            preferred_element_type=jnp.float32)
            acc = acc + jnp.einsum('bnc,co->bno', xk.astype(jnp.bfloat16),
                                   Wmat[k], preferred_element_type=jnp.float32)
        return acc + b

    def cell(xt, h, d):
        inp = jnp.concatenate([xt, h], axis=-1)
        zr = jax.nn.sigmoid(gconv(inp, Wg[d], bg[d]))
        z, r = zr[..., :dim_out], zr[..., dim_out:]
        cand = jnp.concatenate([xt, z * h], axis=-1)
        hc = jnp.tanh(gconv(cand, Wu[d], bu[d]))
        return r * h + (1.0 - r) * hc

    def pgcrn(xd, d):
        h = jnp.zeros((B, N, dim_out), jnp.float32)
        states = []
        for t in range(T):
            h = cell(xd[:, t], h, d)
            states.append(h)
        return xd + jnp.stack(states, axis=1)

    out1 = pgcrn(x, 0)
    out2 = pgcrn(x[:, ::-1], 1)  # backward branch (output not re-flipped)
    return jnp.concatenate([out1, out2], axis=-1)


# ------------------------------- main ------------------------------------------


if __name__ == "__main__":
    B, T, N = 2, 8, 16
    Din = Dout = 4          # PGCRN residual requires dim_in == dim_out
    cheb_k = 2

    key = jax.random.PRNGKey(0)
    kx, ka, k1, k2, k3, k4 = jax.random.split(key, 6)

    x = jax.random.normal(kx, (B, T, N, Din), dtype=jnp.float32)

    # Deterministic "adjacency": row-normalized non-negative random matrix.
    raw = jnp.abs(jax.random.normal(ka, (N, N), dtype=jnp.float32)) + 0.1
    adj = raw / jnp.sum(raw, axis=1, keepdims=True)

    Dio = Din + Dout
    scale = 0.3
    Wg = scale * jax.random.normal(k1, (2, cheb_k, Dio, 2 * Dout), jnp.float32)
    bg = scale * jax.random.normal(k2, (2, 1, 2 * Dout), jnp.float32)
    Wu = scale * jax.random.normal(k3, (2, cheb_k, Dio, Dout), jnp.float32)
    bu = scale * jax.random.normal(k4, (2, 1, Dout), jnp.float32)
    params = (Wg, bg, Wu, bu)

    h_out = jax.block_until_ready(bipgcrn_forward(x, adj, params, cheb_k, Dout))

    ref = bipgcrn_reference(x, adj, params, cheb_k, Dout)
    assert h_out.shape == (B, T, N, 2 * Dout), h_out.shape
    max_err = float(jnp.max(jnp.abs(h_out - ref)))
    assert jnp.allclose(h_out, ref, atol=5e-3, rtol=5e-3), max_err

    print("KERNEL_OK")
</pallas_src>

<mosaic_0001>
module attributes {stable_mosaic.version = 11 : i64} {
  func.func @_bipgcrn_kernel(%arg0: i32, %arg1: memref<32x16xbf16, #tpu.memory_space<vmem>>, %arg2: memref<8x16x32xf32, #tpu.memory_space<vmem>>, %arg3: memref<8x16x16xf32, #tpu.memory_space<vmem>>, %arg4: memref<32x32xbf16, #tpu.memory_space<vmem>>, %arg5: memref<32x16xbf16, #tpu.memory_space<vmem>>, %arg6: memref<8x16x16xf32, #tpu.memory_space<vmem>>, %arg7: memref<16x16xf32, #tpu.memory_space<vmem>>) attributes {dimension_semantics = [#tpu.dimension_semantics<arbitrary>], iteration_bounds = array<i64: 1>, scalar_prefetch = 0 : i64, scratch_operands = 1 : i64, tpu.core_type = #tpu.core_type<tc>, window_params = [{pipeline_mode = #tpu.pipeline_mode<synchronous>, transform_indices = @transform_0, window_bounds = array<i64: 32, 16>}, {pipeline_mode = #tpu.pipeline_mode<synchronous>, transform_indices = @transform_1, window_bounds = array<i64: 8, 16, 32>}, {pipeline_mode = #tpu.pipeline_mode<synchronous>, transform_indices = @transform_2, window_bounds = array<i64: 8, 16, 16>}, {pipeline_mode = #tpu.pipeline_mode<synchronous>, transform_indices = @transform_3, window_bounds = array<i64: 32, 32>}, {pipeline_mode = #tpu.pipeline_mode<synchronous>, transform_indices = @transform_4, window_bounds = array<i64: 32, 16>}, {pipeline_mode = #tpu.pipeline_mode<synchronous>, transform_indices = @transform_5, window_bounds = array<i64: 8, 16, 16>}]} {
    %c0 = arith.constant 0 : index
    %c0_0 = arith.constant 0 : index
    %0 = vector.load %arg1[%c0, %c0_0] : memref<32x16xbf16, #tpu.memory_space<vmem>>, vector<32x16xbf16>
    %c0_1 = arith.constant 0 : index
    %c0_2 = arith.constant 0 : index
    %1 = vector.load %arg4[%c0_1, %c0_2] : memref<32x32xbf16, #tpu.memory_space<vmem>>, vector<32x32xbf16>
    %c0_3 = arith.constant 0 : index
    %c0_4 = arith.constant 0 : index
    %2 = vector.load %arg5[%c0_3, %c0_4] : memref<32x16xbf16, #tpu.memory_space<vmem>>, vector<32x16xbf16>
    %cst = arith.constant 0.000000e+00 : f32
    %3 = vector.broadcast %cst : f32 to vector<16x16xf32>
    %c0_5 = arith.constant 0 : index
    %c0_6 = arith.constant 0 : index
    %4 = vector.load %arg7[%c0_5, %c0_6] : memref<16x16xf32, #tpu.memory_space<vmem>>, vector<16x16xf32>
    tpu.vector_store %arg7[%c0_5, %c0_6], %3 {strides = array<i32>} : memref<16x16xf32, #tpu.memory_space<vmem>>, vector<16x16xf32>,
    %c0_i32 = arith.constant 0 : i32
    %c8_i32 = arith.constant 8 : i32
    %5 = arith.addi %c0_i32, %c8_i32 : i32
    %c1_i32 = arith.constant 1 : i32
    scf.for %arg8 = %c0_i32 to %5 step %c1_i32  : i32 {
      %c0_8 = arith.constant 0 : index
      %c0_9 = arith.constant 0 : index
      %6 = vector.load %arg7[%c0_8, %c0_9] : memref<16x16xf32, #tpu.memory_space<vmem>>, vector<16x16xf32>
      %7 = arith.truncf %6 : vector<16x16xf32> to vector<16x16xbf16>
      %cst_10 = arith.constant dense<0.000000e+00> : vector<32x16xf32>
      %8 = tpu.matmul %0, %7, %cst_10 {dimension_numbers = #tpu.dot_dimension_numbers<[1], [0], [0], [1], [0, 0, 1, 1], [], []>} : vector<32x16xbf16>, vector<16x16xbf16>, vector<32x16xf32> -> vector<32x16xf32>
      %9 = vector.extract_strided_slice %8 {offsets = [0, 0], sizes = [16, 16], strides = [1, 1]} : vector<32x16xf32> to vector<16x16xf32>
      %10 = vector.extract_strided_slice %8 {offsets = [16, 0], sizes = [16, 16], strides = [1, 1]} : vector<32x16xf32> to vector<16x16xf32>
      %11 = tpu.concatenate %9, %10 in 1 : vector<16x16xf32>, vector<16x16xf32> -> vector<16x32xf32>
      %12 = arith.truncf %11 : vector<16x32xf32> to vector<16x32xbf16>
      %cst_11 = arith.constant dense<0.000000e+00> : vector<16x32xf32>
      %13 = tpu.matmul %12, %1, %cst_11 {dimension_numbers = #tpu.dot_dimension_numbers<[1], [0], [0], [1], [0, 0, 1, 1], [], []>} : vector<16x32xbf16>, vector<32x32xbf16>, vector<16x32xf32> -> vector<16x32xf32>
      %14 = arith.index_cast %arg8 : i32 to index
      %c0_12 = arith.constant 0 : index
      %c0_13 = arith.constant 0 : index
      %15 = vector.load %arg2[%14, %c0_12, %c0_13] : memref<8x16x32xf32, #tpu.memory_space<vmem>>, vector<1x16x32xf32>
      %16 = vector.shape_cast %15 : vector<1x16x32xf32> to vector<16x32xf32>
      %17 = arith.addf %13, %16 : vector<16x32xf32>
      %18 = arith.negf %17 : vector<16x32xf32>
      %19 = math.exp %18 : vector<16x32xf32>
      %cst_14 = arith.constant 1.000000e+00 : f32
      %20 = vector.broadcast %cst_14 : f32 to vector<16x32xf32>
      %21 = arith.addf %20, %19 : vector<16x32xf32>
      %22 = arith.divf %20, %21 : vector<16x32xf32>
      %23 = vector.extract_strided_slice %22 {offsets = [0, 0], sizes = [16, 16], strides = [1, 1]} : vector<16x32xf32> to vector<16x16xf32>
      %24 = vector.extract_strided_slice %22 {offsets = [0, 16], sizes = [16, 16], strides = [1, 1]} : vector<16x32xf32> to vector<16x16xf32>
      %25 = arith.mulf %23, %6 : vector<16x16xf32>
      %26 = arith.truncf %25 : vector<16x16xf32> to vector<16x16xbf16>
      %cst_15 = arith.constant dense<0.000000e+00> : vector<32x16xf32>
      %27 = tpu.matmul %0, %26, %cst_15 {dimension_numbers = #tpu.dot_dimension_numbers<[1], [0], [0], [1], [0, 0, 1, 1], [], []>} : vector<32x16xbf16>, vector<16x16xbf16>, vector<32x16xf32> -> vector<32x16xf32>
      %28 = vector.extract_strided_slice %27 {offsets = [0, 0], sizes = [16, 16], strides = [1, 1]} : vector<32x16xf32> to vector<16x16xf32>
      %29 = vector.extract_strided_slice %27 {offsets = [16, 0], sizes = [16, 16], strides = [1, 1]} : vector<32x16xf32> to vector<16x16xf32>
      %30 = tpu.concatenate %28, %29 in 1 : vector<16x16xf32>, vector<16x16xf32> -> vector<16x32xf32>
      %31 = arith.truncf %30 : vector<16x32xf32> to vector<16x32xbf16>
      %cst_16 = arith.constant dense<0.000000e+00> : vector<16x16xf32>
      %32 = tpu.matmul %31, %2, %cst_16 {dimension_numbers = #tpu.dot_dimension_numbers<[1], [0], [0], [1], [0, 0, 1, 1], [], []>} : vector<16x32xbf16>, vector<32x16xbf16>, vector<16x16xf32> -> vector<16x16xf32>
      %33 = arith.index_cast %arg8 : i32 to index
      %c0_17 = arith.constant 0 : index
      %c0_18 = arith.constant 0 : index
      %34 = vector.load %arg3[%33, %c0_17, %c0_18] : memref<8x16x16xf32, #tpu.memory_space<vmem>>, vector<1x16x16xf32>
      %35 = vector.shape_cast %34 : vector<1x16x16xf32> to vector<16x16xf32>
      %36 = arith.addf %32, %35 : vector<16x16xf32>
      %37 = math.tanh %36 : vector<16x16xf32>
      %38 = arith.mulf %24, %6 : vector<16x16xf32>
      %cst_19 = arith.constant 1.000000e+00 : f32
      %39 = vector.broadcast %cst_19 : f32 to vector<16x16xf32>
      %40 = arith.subf %39, %24 : vector<16x16xf32>
      %41 = arith.mulf %40, %37 : vector<16x16xf32>
      %42 = arith.addf %38, %41 : vector<16x16xf32>
      %c0_20 = arith.constant 0 : index
      %c0_21 = arith.constant 0 : index
      %43 = vector.load %arg7[%c0_20, %c0_21] : memref<16x16xf32, #tpu.memory_space<vmem>>, vector<16x16xf32>
      tpu.vector_store %arg7[%c0_20, %c0_21], %42 {strides = array<i32>} : memref<16x16xf32, #tpu.memory_space<vmem>>, vector<16x16xf32>,
      %44 = arith.index_cast %arg8 : i32 to index
      %c0_22 = arith.constant 0 : index
      %c0_23 = arith.constant 0 : index
      %45 = vector.load %arg6[%44, %c0_22, %c0_23] : memref<8x16x16xf32, #tpu.memory_space<vmem>>, vector<1x16x16xf32>
      %46 = vector.shape_cast %45 : vector<1x16x16xf32> to vector<16x16xf32>
      %47 = vector.shape_cast %42 : vector<16x16xf32> to vector<1x16x16xf32>
      tpu.vector_store %arg6[%44, %c0_22, %c0_23], %47 {strides = array<i32>} : memref<8x16x16xf32, #tpu.memory_space<vmem>>, vector<1x16x16xf32>,
    }
    %c8_i32_7 = arith.constant 8 : i32
    return
  }
  func.func @transform_0(%arg0: i32) -> (i32, i32) {
    %c0_i32 = arith.constant 0 : i32
    %c0_i32_0 = arith.constant 0 : i32
    %c0_i32_1 = arith.constant 0 : i32
    return %c0_i32, %c0_i32_0 : i32, i32
  }
  func.func @transform_1(%arg0: i32) -> (i32, i32, i32) {
    %c0_i32 = arith.constant 0 : i32
    %c0_i32_0 = arith.constant 0 : i32
    %c0_i32_1 = arith.constant 0 : i32
    %c0_i32_2 = arith.constant 0 : i32
    return %c0_i32, %c0_i32_0, %c0_i32_1 : i32, i32, i32
  }
  func.func @transform_2(%arg0: i32) -> (i32, i32, i32) {
    %c0_i32 = arith.constant 0 : i32
    %c0_i32_0 = arith.constant 0 : i32
    %c0_i32_1 = arith.constant 0 : i32
    %c0_i32_2 = arith.constant 0 : i32
    return %c0_i32, %c0_i32_0, %c0_i32_1 : i32, i32, i32
  }
  func.func @transform_3(%arg0: i32) -> (i32, i32) {
    %c0_i32 = arith.constant 0 : i32
    %c0_i32_0 = arith.constant 0 : i32
    %c0_i32_1 = arith.constant 0 : i32
    return %c0_i32, %c0_i32_0 : i32, i32
  }
  func.func @transform_4(%arg0: i32) -> (i32, i32) {
    %c0_i32 = arith.constant 0 : i32
    %c0_i32_0 = arith.constant 0 : i32
    %c0_i32_1 = arith.constant 0 : i32
    return %c0_i32, %c0_i32_0 : i32, i32
  }
  func.func @transform_5(%arg0: i32) -> (i32, i32, i32) {
    %c0_i32 = arith.constant 0 : i32
    %c0_i32_0 = arith.constant 0 : i32
    %c0_i32_1 = arith.constant 0 : i32
    %c0_i32_2 = arith.constant 0 : i32
    return %c0_i32, %c0_i32_0, %c0_i32_1 : i32, i32, i32
  }
}

</mosaic_0001>

<bundles_post_ra>
// kernel: tpu_custom_call.1
= control target key start
LH: loop header
LB: loop body
LE: loop exit
PB: predicated region body
PF: predicated region fallthrough
CT: control target
= control target key end

     0   :  { %10 = vsyncpa [#allocation4], 0  ;;  %s783_s0 = inlined_call_operand.vmem [shape: bf16[32,16], index: 0, kind: input, shape index: {}]   ;;  %s784_s1 = inlined_call_operand.hbm [shape: f32[8,16,32], index: 1, kind: input, shape index: {}]   ;;  %s785_s2 = inlined_call_operand.hbm [shape: f32[8,16,16], index: 2, kind: input, shape index: {}]   ;;  %s786_s3 = inlined_call_operand.vmem [shape: bf16[32,32], index: 3, kind: input, shape index: {}]   ;;  %s787_s4 = inlined_call_operand.vmem [shape: bf16[32,16], index: 4, kind: input, shape index: {}]   ;;  %s788_s5 = inlined_call_operand.hbm [shape: f32[8,16,16], index: 5, kind: output, shape index: {}]  }
   0x1   :  { %11 = vsyncpa [#allocation7], 0 }
   0x2   :  { %12 = vsyncpa [#allocation5], 0  ;;  %s588_s18 = smov [#allocation3]   ;;  %s508_s22 = scalar_lea.hbm %s784_s1, 2048 }
   0x3   :  { %s20_s19 = sshll.u32 %s588_s18, 4  ;;  %p509_p0 = scmp.ne.s32.totalorder %s784_s1, %s508_s22  ;;  %s21_s19 = int_to_ptr.vmem [resolvable:$true] %s20_s19 }
   0x4   :  { %p512_p1 = scmp.lt.u32.totalorder %s508_s22, %s784_s1 }
   0x6   :  { %p514_p2 = pnand %p512_p1, %p509_p0 }
   0x8   :  { %517 = shalt.err (!%p514_p2)
}
   0x9   :  { %s518_s27 = scalar_lea.vmem %s21_s19, 2048  ;;  %p523_p4 = scmp.lt.s32.totalorder %s21_s19, %s21_s19 }
   0xa   :  { %p519_p3 = scmp.ne.s32.totalorder %s21_s19, %s518_s27  ;;  %p524_p5 = scmp.lt.s32.totalorder %s518_s27, %s518_s27 }
   0xc   :  { %p525_p6 = por %p524_p5, %p523_p4 }
   0xe   :  { %p526_p7 = pnand %p525_p6, %p519_p3 }
  0x10   :  { %529 = shalt.err (!%p526_p7)
}
  0x11   :  { %s589_s28 = smov 128   ;;  %s590_s29 = smov 8  }
  0x12   :  { %26 = dma.hbm_to_vmem [thread:$0]  %s784_s1, 2048, %s21_s19, [#allocation4], %s589_s28, %s589_s28, %s590_s29  }
  0x13   :  { %s591_s7 = smov [#allocation6]   ;;  %s530_s11 = scalar_lea.hbm %s785_s2, 2048 }
  0x14   :  { %s32_s8 = sshll.u32 %s591_s7, 4  ;;  %p531_p8 = scmp.ne.s32.totalorder %s785_s2, %s530_s11  ;;  %s33_s8 = int_to_ptr.vmem [resolvable:$true] %s32_s8 }
  0x15   :  { %p534_p9 = scmp.lt.u32.totalorder %s530_s11, %s785_s2 }
  0x17   :  { %p536_p10 = pnand %p534_p9, %p531_p8 }
  0x19   :  { %539 = shalt.err (!%p536_p10)
}
  0x1a   :  { %s540_s16 = scalar_lea.vmem %s33_s8, 2048  ;;  %p545_p12 = scmp.lt.s32.totalorder %s33_s8, %s33_s8 }
  0x1b   :  { %p541_p11 = scmp.ne.s32.totalorder %s33_s8, %s540_s16  ;;  %p546_p13 = scmp.lt.s32.totalorder %s540_s16, %s540_s16 }
  0x1d   :  { %p547_p0 = por %p546_p13, %p545_p12 }
  0x1f   :  { %p548_p1 = pnand %p547_p0, %p541_p11 }
  0x21   :  { %551 = shalt.err (!%p548_p1)
}
  0x22   :  { %38 = dma.hbm_to_vmem [thread:$0]  %s785_s2, 2048, %s33_s8, [#allocation7], %s589_s28, %s589_s28, %s590_s29  }
  0x23   :  { %578 = dma.done.wait [#allocation4], 2048  }
  0x24   :  { %579 = vsyncadd [#allocation4], 4294965248 }
  0x25   :  { %580 = dma.done.wait [#allocation7], 2048  }
  0x26   :  { %581 = vsyncadd [#allocation7], 4294965248  ;;  %vm62_vm0 = vcmask 130048   ;;  %v592_v0 = vmov 0.0   ;;  %v663_v1 = vld [vmem:[%s783_s0] sm:$0xf] }
  0x27   :  { %63 = vst.msk [vmem:[#allocation2] sm:$0xff] %vm62_vm0, %v592_v0  ;;  %64 = vst.msk [vmem:[#allocation2 + $0x8] sm:$0xff] %vm62_vm0, %v592_v0  ;;  %v668_v2 = vld [vmem:[%s783_s0 + $0x4] sm:$0xf]  ;;  %v673_v3 = vld [vmem:[%s783_s0 + $0x8] sm:$0xf] }
  0x28   :  { %v678_v4 = vld [vmem:[%s783_s0 + $0xc] sm:$0xf]  ;;  %v683_v5 = vld [vmem:[%s786_s3] sm:$0xf]  ;;  %v688_v6 = vld [vmem:[%s786_s3 + $0x4] sm:$0xf] }
  0x29   :  { %v693_v7 = vld [vmem:[%s786_s3 + $0x8] sm:$0xf]  ;;  %v698_v8 = vld [vmem:[%s786_s3 + $0xc] sm:$0xf]  ;;  %v703_v9 = vld [vmem:[%s787_s4] sm:$0xf] }
  0x2a   :  { %v708_v10 = vld [vmem:[%s787_s4 + $0x4] sm:$0xf]  ;;  %v713_v11 = vld [vmem:[%s787_s4 + $0x8] sm:$0xf]  ;;  %v718_v12 = vld [vmem:[%s787_s4 + $0xc] sm:$0xf] }
  0x2b   :  { %s720_s3 = smov 0  }
  0x2c LB: > { %v413_v15 = vcombine.low %v663_v1, %v668_v2  ;;  %v414_v17 = vcombine.low %v673_v3, %v678_v4  ;;  %s593_s4 = smov 16   ;;  %v418_v18 = vcombine.low %v683_v5, %v688_v6  ;;  %v594_v19 = vmov 0.0   ;;  %s745_s1 = sshll.u32 %s586_s3, 4  ;;  %s586_s3 = sphi %s720_s3, %s70_s3  }
  0x2d   : > { %446 = vmatprep.subr.bf16.mxu1 %v594_v19  ;;  %v419_v20 = vcombine.low %v693_v7, %v698_v8  ;;  %vm595_vm1 = vmmov 0   ;;  %vm166_vm2 = vcmask 261120   ;;  %s151_s17 = scalar_lea.vmem [#allocation3], %s745_s1  ;;  %v425_v51 = vcombine.low %v703_v9, %v708_v10  ;;  %s286_s18 = scalar_lea.vmem [#allocation6], %s745_s1 }
  0x2e   : > { %v71_v13 = vld [vmem:[#allocation2] sm:$0xff]  ;;  %v72_v14 = vld [vmem:[#allocation2 + $0x8] sm:$0xff]  ;;  %442 = vmatprep.mubr.msk.bf16.mxu0 %vm62_vm0, %v413_v15  ;;  %447 = vmatpush3.bf16.msra.mxu1 %v418_v18  ;;  %v152_v32 = vld [vmem:[%s151_s17] sm:$0xff]  ;;  %v426_v52 = vcombine.low %v713_v11, %v718_v12  ;;  %s596_s19 = smov 112   ;;  %s381_s20 = scalar_lea.vmem [#allocation8], %s745_s1 }
  0x2f   : > { %v73_v16 = vpack.c.bf16 %v72_v14, %v71_v13  ;;  %349 = vrot.lane.b32.xlu1 %v71_v13, %s593_s4  ;;  %448 = vmatprep.subr.bf16.mxu1 %v594_v19  ;;  %v153_v34 = vld [vmem:[%s151_s17 + $0x8] sm:$0xff]  ;;  %v287_v0 = vld [vmem:[%s286_s18] sm:$0xff]  ;;  %s70_s3 = sadd.s32 1, %s586_s3  }
  0x30   : > { %450 = vmatprep.mubr.msk.bf16.mxu1 %vm595_vm1, %v594_v19  ;;  %p67_p2 = scmp.ge.s32.totalorder %s70_s3, 8  }
  0x31   : > { %440 = vmatprep.subr.bf16.mxu0 %v73_v16  ;;  %s597_s21 = smov (%p67_p2), [#allocation8]  }
  0x32   : > { %441 = vmatpush3.bf16.msra.mxu0 %v73_v16  ;;  %449 = vmatpush3.bf16.msra.mxu1 %v419_v20  ;;  %s389_s2 = sshll.u32 (%p67_p2), %s597_s21, 4  ;;  %s390_s2 = int_to_ptr.vmem [resolvable:$true] %s389_s2 }
  0x33   : > { %351 = vrot.lane.b32.xlu1 %v72_v14, %s593_s4  ;;  %460 = vmatprep.subr.bf16.mxu1 %v594_v19  ;;  %s552_s22 = scalar_lea.vmem (%p67_p2), %s390_s2, 2048  ;;  %p557_p4 = scmp.lt.s32.totalorder (%p67_p2), %s390_s2, %s390_s2 }
  0x34   :  { %p553_p3 = scmp.ne.s32.totalorder (%p67_p2), %s390_s2, %s552_s22  ;;  %p558_p5 = scmp.lt.s32.totalorder (%p67_p2), %s552_s22, %s552_s22 }
  0x35   : > { %443 = vmatmul.mubr.msk.bf16.vlgmr.msra.gmra.mrb[0].mxu0 %vm62_vm0, %v414_v17 }
  0x36   : > { %456 = vmatprep.mubr.msk.bf16.mxu0 %vm62_vm0, %v413_v15  ;;  %p559_p6 = por (%p67_p2), %p558_p5, %p557_p4 }
  0x38   :  { %p560_p7 = pnand (%p67_p2), %p559_p6, %p553_p3 }
 0x108   : > { %v444_v21 = vpop.f32.mrb[0].mxu0 }
 0x109   : > { %v124_v22 = vpop.f32.mrb[1].mxu0 }
 0x10a   : > { %v445_v23 = vpop.f32.mrb[2].mxu0 }
 0x10b   : > { %v486_v24 = vpack.i.bf16 %v445_v23, %v444_v21  ;;  %v127_v25 = vpop.f32.mrb[3].mxu0 }
 0x10d   : > { %487 = vrot.lane.b32.xlu0 %v486_v24, %s593_s4 }
 0x17f   : > { %v488_v26 = vpop.permute.xlu0 %487 }
 0x180   : > { %v490_v27 = vunpack.i.h.bf16 %v488_v26  ;;  %v489_v28 = vunpack.i.l.bf16 %v488_v26 }
 0x182   : > { %v147_v29 = vsel %vm62_vm0, %v124_v22, %v489_v28  ;;  %v148_v30 = vsel %vm62_vm0, %v127_v25, %v490_v27  ;;  %v350_v22 = vpop.permute.xlu1 %349 }
 0x183   : > { %v149_v31 = vpack.c.bf16 %v148_v30, %v147_v29 }
 0x185   : > { %451 = vmatmul.mubr.msk.bf16.vlgmr.msra.gmra.mrb[0].mxu1 %vm166_vm2, %v149_v31 }
 0x186   : > { %464 = vmatprep.mubr.msk.bf16.mxu1 %vm595_vm1, %v594_v19  ;;  %461 = vmatpush3.bf16.msra.mxu1 %v425_v51  ;;  %v352_v23 = vpop.permute.xlu1 %351 }
 0x187   : > { %462 = vmatprep.subr.bf16.mxu1 %v594_v19 }
 0x18a   : > { %463 = vmatpush3.bf16.msra.mxu1 %v426_v52 }
 0x258   : > { %v204_v33 = vpop.f32.mrb[0].mxu1 }
 0x259   : > { %v205_v35 = vadd.f32 %v204_v33, %v152_v32  ;;  %v452_v36 = vpop.f32.mrb[1].mxu1 }
 0x25a   : > { %v207_v37 = vpop.f32.mrb[2].mxu1 }
 0x25b   : > { %v421_v38 = vmul.f32 -1.442695, %v205_v35  ;;  %v208_v39 = vadd.f32 %v207_v37, %v153_v34  ;;  %v453_v40 = vpop.f32.mrb[3].mxu1 }
 0x25d   : > { %496 = vpow2.f32 %v421_v38  ;;  %v422_v41 = vmul.f32 -1.442695, %v208_v39 }
 0x25f   : > { %498 = vpow2.f32 %v422_v41 }
 0x267   : > { %v497_v42 = vpop.eup %496 }
 0x268   : > { %v217_v43 = vadd.f32 1.0, %v497_v42 }
 0x269   : > { %v499_v44 = vpop.eup %498 }
 0x26a   : > { %500 = vrcp.f32 %v217_v43  ;;  %v218_v45 = vadd.f32 1.0, %v499_v44 }
 0x26c   : > { %502 = vrcp.f32 %v218_v45 }
 0x274   : > { %v501_v46 = vpop.eup %500 }
 0x275   : > { %v223_v48 = vmul.f32 %v501_v46, %v71_v13  ;;  %v357_v24 = vsub.f32 1.0, %v501_v46  ;;  %v355_v26 = vmul.f32 %v501_v46, %v350_v22 }
 0x276   : > { %v503_v47 = vpop.eup %502 }
 0x277   : > { %v224_v49 = vmul.f32 %v503_v47, %v72_v14  ;;  %v288_v14 = vld [vmem:[%s286_s18 + $0x8] sm:$0xff]  ;;  %v358_v28 = vsub.f32 1.0, %v503_v47  ;;  %v356_v30 = vmul.f32 %v503_v47, %v352_v23 }
 0x279   : > { %v225_v50 = vpack.c.bf16 %v224_v49, %v223_v48 }
 0x27b   : > { %454 = vmatprep.subr.bf16.mxu0 %v225_v50 }
 0x27c   : > { %455 = vmatpush3.bf16.msra.mxu0 %v225_v50 }
 0x27f   : > { %457 = vmatmul.mubr.msk.bf16.vlgmr.msra.gmra.mrb[4].mxu0 %vm62_vm0, %v414_v17 }
 0x352   : > { %v458_v53 = vpop.f32.mrb[4].mxu0 }
 0x353   : > { %v260_v54 = vpop.f32.mrb[5].mxu0 }
 0x354   : > { %v459_v55 = vpop.f32.mrb[6].mxu0 }
 0x355   : > { %v491_v56 = vpack.i.bf16 %v459_v55, %v458_v53  ;;  %v263_v57 = vpop.f32.mrb[7].mxu0 }
 0x357   : > { %492 = vrot.lane.b32.xlu0 %v491_v56, %s593_s4 }
 0x3c9   : > { %v493_v58 = vpop.permute.xlu0 %492 }
 0x3ca   : > { %v495_v59 = vunpack.i.h.bf16 %v493_v58  ;;  %v494_v60 = vunpack.i.l.bf16 %v493_v58 }
 0x3cc   : > { %v283_v61 = vsel %vm62_vm0, %v260_v54, %v494_v60  ;;  %v284_v62 = vsel %vm62_vm0, %v263_v57, %v495_v59 }
 0x3cd   : > { %v285_v63 = vpack.c.bf16 %v284_v62, %v283_v61 }
 0x3cf   : > { %465 = vmatmul.mubr.msk.bf16.vlgmr.msra.gmra.mrb[4].mxu1 %vm166_vm2, %v285_v63 }
 0x4a2   : > { %v338_v13 = vpop.f32.mrb[4].mxu1 }
 0x4a3   : > { %v339_v15 = vadd.f32 %v338_v13, %v287_v0  ;;  %v466_v16 = vpop.f32.mrb[5].mxu1 }
 0x4a4   : > { %v341_v17 = vpop.f32.mrb[6].mxu1 }
 0x4a5   : > { %504 = vtanh.f32 %v339_v15  ;;  %v342_v18 = vadd.f32 %v341_v17, %v288_v14  ;;  %v467_v19 = vpop.f32.mrb[7].mxu1 }
 0x4a7   : > { %506 = vtanh.f32 %v342_v18 }
 0x4af   : > { %v505_v20 = vpop.eup %504 }
 0x4b0   : > { %361 = vrot.lane.b32.xlu0 %v505_v20, %s593_s4 }
 0x4b1   : > { %v507_v21 = vpop.eup %506 }
 0x4b2   : > { %363 = vrot.lane.b32.xlu1 %v507_v21, %s593_s4 }
 0x522   : > { %v362_v25 = vpop.permute.xlu0 %361 }
 0x523   : > { %v367_v27 = vmul.f32 %v362_v25, %v357_v24 }
 0x524   : > { %v364_v29 = vpop.permute.xlu1 %363 }
 0x525   : > { %v369_v31 = vadd.f32 %v367_v27, %v355_v26  ;;  %v368_v32 = vmul.f32 %v364_v29, %v358_v28 }
 0x527   : > { %v370_v33 = vadd.f32 %v368_v32, %v356_v30  ;;  %373 = vrot.lane.b32.xlu0 %v369_v31, %s596_s19 }
 0x529   : > { %375 = vrot.lane.b32.xlu1 %v370_v33, %s596_s19 }
 0x596   :  { %69 = sbr.rel (!%p67_p2) target bundleno = 44 (0x2c), region = 58 }
 0x599   : > { %v374_v34 = vpop.permute.xlu0 %373 }
 0x59a   : > { %379 = vst.msk [vmem:[#allocation2] sm:$0xff] %vm62_vm0, %v374_v34  ;;  %382 = vst.msk [vmem:[%s381_s20] sm:$0xff] %vm62_vm0, %v374_v34 }
 0x59b   : > { %v376_v35 = vpop.permute.xlu1 %375 }
 0x59c   : > { %380 = vst.msk [vmem:[#allocation2 + $0x8] sm:$0xff] %vm62_vm0, %v376_v35  ;;  %383 = vst.msk [vmem:[%s381_s20 + $0x8] sm:$0xff] %vm62_vm0, %v376_v35 }
 0x59d   :  { %563 = shalt.err (!%p560_p7)
}
 0x59e   :  { %s564_s25 = scalar_lea.hbm %s788_s5, 2048 }
 0x59f   :  { %p565_p8 = scmp.ne.s32.totalorder %s788_s5, %s564_s25  ;;  %p568_p9 = scmp.lt.u32.totalorder %s564_s25, %s788_s5 }
 0x5a1   :  { %p570_p10 = pnand %p568_p9, %p565_p8 }
 0x5a3   :  { %573 = shalt.err (!%p570_p10)
}
 0x5a4   :  { %395 = dma.vmem_to_hbm [thread:$0]  %s390_s2, 2048, %s788_s5, [#allocation5], %s589_s28, %s589_s28, %s590_s29  }
 0x5a5   :  { %582 = dma.done.wait [#allocation5], 2048  }
 0x5a6   :  { %583 = vsyncadd [#allocation5], 4294965248 }
 0x5a7   :  { %399 = vsyncpa [#allocation4], 1 }
 0x5a8   :  { %400 = vsyncpa [#allocation7], 1 }
 0x5a9   :  { %401 = vsyncpa [#allocation5], 1 }

</bundles_post_ra>
